<compile_context>
chip_gen: v5e
topology: v5e:2x2
jax: 0.10.0
libtpu: 0.0.40
codegen_flags: <defaults>
</compile_context>

<pallas_src>
import jax
import jax.numpy as jnp
from jax.experimental import pallas as pl
from jax.experimental.pallas import tpu as pltpu


def _round_up(n: int, m: int) -> int:
    return ((n + m - 1) // m) * m


# ---------------------------------------------------------------------------
# Hardware introspection (defensive; only affects tiling heuristics, never
# numerics, so conservative fallbacks are safe).
# ---------------------------------------------------------------------------
def _hw_info():
    """Returns (physical_vmem_bytes, tensorcores_per_device)."""
    vmem = None
    cores = None
    try:
        info = pltpu.get_tpu_info()
        vmem = getattr(info, "vmem_capacity_bytes", None)
        for name in ("num_cores", "core_count", "tensorcore_count", "num_tensorcores"):
            val = getattr(info, name, None)
            if val:
                cores = int(val)
                break
    except Exception:
        pass
    kind = ""
    try:
        kind = jax.devices()[0].device_kind.lower()
    except Exception:
        pass
    if vmem is None:
        # v5e/v6e: 128 MiB per TC; v7x: 64 MiB per TC.  Unknown -> conservative.
        vmem = (64 << 20) if "v7" in kind else (128 << 20)
    if cores is None:
        # Parts with 2 TensorCores per device benefit from splitting the
        # "parallel" batch axis; the lite parts (v5e/v6e) are single-TC.
        cores = 2 if any(t in kind for t in ("v7", "v4", "v5p", "v5 p")) else 1
    return int(vmem), int(cores)


def _supports_single_buffered() -> bool:
    """True iff this Pallas version supports BlockSpec(pipeline_mode=Buffered(1))."""
    try:
        pl.BlockSpec((8, 128), lambda i: (0, 0), pipeline_mode=pl.Buffered(1))
        return True
    except (AttributeError, TypeError):
        return False


def _resident_spec(shape, index_map, single_buffer):
    # Grid-invariant operand: fetched once, so a single VMEM buffer suffices
    # (halves the resident weight footprint vs the default double-buffering).
    if single_buffer:
        return pl.BlockSpec(shape, index_map, pipeline_mode=pl.Buffered(1))
    return pl.BlockSpec(shape, index_map)


def _choose_tile_b(Bp, granule, cap_rows, want_split):
    """Largest row tile (multiple of `granule`, <= cap_rows) that divides Bp.

    On multi-TensorCore parts, prefer tiles that give an EVEN number of grid
    steps so dimension_semantics=("parallel",) hands both cores equal work.
    Single-TC parts take the largest divisor (fewer steps, less per-step
    overhead, better MXU fill on the dependent-dot chain)."""
    cap = max(granule, min(cap_rows, Bp))
    cap -= cap % granule
    divisors = [t for t in range(granule, cap + 1, granule) if Bp % t == 0]
    if not divisors:
        return granule  # Bp is always a multiple of granule -> unreachable
    if want_split:
        even = [t for t in divisors if (Bp // t) % 2 == 0]
        if even:
            return max(even)
    return max(divisors)


# ---------------------------------------------------------------------------
# Kernel
# ---------------------------------------------------------------------------
def aliased_mlp_kernel(x_ref, y_ref, p_ref, wl_ref, pw_ref, b_ref, o_ref):
    """Fused ModelWithParamAlias forward for one row tile.

    p/wl/b are the ALIASED parameters shared by both pipeline stages; pw holds
    the precomputed f32 product P @ Wlin^T (cast to the compute dtype), folding
    the two stage-1 matmuls into one."""
    cdt = p_ref.dtype
    bias = b_ref[...].astype(jnp.float32)       # bias + ReLU stay f32 on the VPU

    # ---- pipeline stage 0: x @ P + y -> lin0 -> relu ----
    x = x_ref[...].astype(cdt)                  # per-tile VPU cast (no wrapper pass)
    h = jnp.dot(x, p_ref[...], preferred_element_type=jnp.float32)
    h = h + y_ref[...].astype(jnp.float32)
    h = jnp.dot(h.astype(cdt), wl_ref[...], preferred_element_type=jnp.float32) + bias
    h = jnp.maximum(h, 0.0)

    # ---- pipeline stage 1 (after pipe_split, SAME aliased params) ----
    # (h @ P) @ Wlin^T == h @ (P @ Wlin^T): one dot instead of two.
    h = jnp.dot(h.astype(cdt), pw_ref[...], preferred_element_type=jnp.float32) + bias
    h = jnp.maximum(h, 0.0)

    o_ref[...] = h.astype(o_ref.dtype)


def _pallas_forward(xp, yp, pp, wlp, pwp, blp, *, tile_b, out_dtype,
                    single_buffer, vmem_limit_bytes):
    Bp, Dp = xp.shape
    act_bytes = jnp.dtype(xp.dtype).itemsize
    w_bytes = jnp.dtype(pp.dtype).itemsize

    grid_spec = pltpu.PrefetchScalarGridSpec(
        num_scalar_prefetch=0,
        grid=(Bp // tile_b,),
        in_specs=[
            pl.BlockSpec((tile_b, Dp), lambda i: (i, 0)),                 # x tile
            pl.BlockSpec((tile_b, Dp), lambda i: (i, 0)),                 # y tile
            _resident_spec((Dp, Dp), lambda i: (0, 0), single_buffer),    # P (aliased mm_param0/1)
            _resident_spec((Dp, Dp), lambda i: (0, 0), single_buffer),    # Wlin^T (aliased lin0/1)
            _resident_spec((Dp, Dp), lambda i: (0, 0), single_buffer),    # PW = P @ Wlin^T
            _resident_spec((1, Dp), lambda i: (0, 0), single_buffer),     # bias (f32, aliased)
        ],
        out_specs=pl.BlockSpec((tile_b, Dp), lambda i: (i, 0)),
    )

    compiler_kw = dict(dimension_semantics=("parallel",))
    if vmem_limit_bytes is not None:
        compiler_kw["vmem_limit_bytes"] = int(vmem_limit_bytes)

    cost = pl.CostEstimate(
        flops=3 * 2 * Bp * Dp * Dp,                                      # three DxD matmuls
        transcendentals=0,
        bytes_accessed=(3 * Bp * Dp * act_bytes                          # x, y, out
                        + 3 * Dp * Dp * w_bytes + Dp * 4),               # P, W, PW, bias
    )

    return pl.pallas_call(
        aliased_mlp_kernel,
        out_shape=jax.ShapeDtypeStruct((Bp, Dp), out_dtype),
        grid_spec=grid_spec,
        compiler_params=pltpu.CompilerParams(**compiler_kw),
        cost_estimate=cost,
    )(xp, yp, pp, wlp, pwp, blp)


def model_forward(x, y, p, w_lin_t, b_lin, *, tile_b=None,
                  compute_dtype=jnp.bfloat16, vmem_limit_bytes=None):
    """Fused forward of ModelWithParamAlias.

    x, y    : [B, D] activations (kept in their input dtype; cast in-kernel)
    p       : [D, D] aliased mm_param0 == mm_param1
    w_lin_t : [D, D] lin.weight transposed to [in, out] (lin0 == lin1)
    b_lin   : [1, D] lin.bias (lin0 == lin1)
    """
    B, D = x.shape
    out_dtype = x.dtype
    compute_dtype = jnp.dtype(compute_dtype if compute_dtype is not None else x.dtype)
    cbytes = compute_dtype.itemsize
    act_bytes = jnp.dtype(x.dtype).itemsize

    vmem_physical, num_cores = _hw_info()
    single_buffer = _supports_single_buffered()

    # Lane/sublane alignment: feature dim -> multiple of 128 (lane-dense stores,
    # full-width MXU operands); batch -> sublane granule (bf16 packs 2 rows/sublane).
    Dp = max(_round_up(D, 128), 128)
    granule = 16 if cbytes < 4 else 8
    Bp = _round_up(B, granule)

    # Resident (grid-invariant) weight footprint: P, Wlin^T, PW (+ tiny f32 bias).
    weight_vmem = 3 * Dp * Dp * cbytes * (1 if single_buffer else 2) + 2 * Dp * 4

    # Row-tile cap from a conservative VMEM budget: x/y/out double-buffered at the
    # activation dtype + ~3 f32 intermediates of tile_b x Dp live in the body.
    per_row_vmem = Dp * (6 * act_bytes + 3 * 4)
    budget = min(vmem_physical // 2, 48 << 20)
    cap_rows = max(granule, (budget - weight_vmem) // max(per_row_vmem, 1))
    cap_rows = min(int(cap_rows), 512)

    if tile_b is None:
        tile_b = _choose_tile_b(Bp, granule, cap_rows, want_split=(num_cores >= 2))
    tile_b = max(granule, min(_round_up(tile_b, granule), Bp))
    Bp = _round_up(Bp, tile_b)   # no-op on the default path (tile_b divides Bp)

    if vmem_limit_bytes is None:
        act_vmem = 6 * tile_b * Dp * act_bytes          # x, y, out double-buffered
        scratch_vmem = 3 * tile_b * Dp * 4              # f32 intermediates
        est = weight_vmem + act_vmem + scratch_vmem
        cap = min(int(0.75 * vmem_physical), 96 << 20)  # never exceed the chip (64 MiB on v7x)
        vmem_limit_bytes = max(min(int(1.2 * est), cap), min(32 << 20, cap))

    # Fold the two stage-1 matmuls: (h @ P) @ W == h @ (P @ W).  One-time f32
    # D^3 precompute (wrapper-side XLA matmul), then a single one-time cast.
    pw = jnp.dot(p.astype(jnp.float32), w_lin_t.astype(jnp.float32),
                 precision=jax.lax.Precision.HIGHEST,
                 preferred_element_type=jnp.float32)

    # One-time weight casts (small).  Activations are NOT cast here — that would
    # be an extra HBM round trip; the kernel casts each tile on the VPU.
    p_c = p.astype(compute_dtype)
    wl_c = w_lin_t.astype(compute_dtype)
    pw_c = pw.astype(compute_dtype)
    b_f32 = b_lin.astype(jnp.float32)

    def pad2(a, rows, cols):
        r, c = a.shape
        if r == rows and c == cols:
            return a
        return jnp.pad(a, ((0, rows - r), (0, cols - c)))

    xp = pad2(x, Bp, Dp)
    yp = pad2(y, Bp, Dp)
    pp = pad2(p_c, Dp, Dp)
    wlp = pad2(wl_c, Dp, Dp)
    pwp = pad2(pw_c, Dp, Dp)
    blp = pad2(b_f32, 1, Dp)

    out = _pallas_forward(xp, yp, pp, wlp, pwp, blp,
                          tile_b=tile_b, out_dtype=out_dtype,
                          single_buffer=single_buffer,
                          vmem_limit_bytes=vmem_limit_bytes)
    return out[:B, :D]


if __name__ == "__main__":
    key = jax.random.PRNGKey(0)
    d_hid = 128   # small but lane-dense (multiple of 128); module default is 512
    batch = 64    # 2 x 32-row tiles on 2-TC parts, one 64-row tile on 1-TC parts

    kx, ky, kp, kw, kb = jax.random.split(key, 5)
    x = jax.random.normal(kx, (batch, d_hid), jnp.float32)
    y = jax.random.normal(ky, (batch, d_hid), jnp.float32)

    # torch init: mm_param ~ randn; Linear weight/bias ~ U(-1/sqrt(fan_in), +1/sqrt(fan_in)).
    p = jax.random.normal(kp, (d_hid, d_hid), jnp.float32)          # aliased mm_param0/1
    bound = 1.0 / jnp.sqrt(d_hid)
    w_lin_t = jax.random.uniform(kw, (d_hid, d_hid), jnp.float32, -bound, bound)  # lin weight^T
    b_lin = jax.random.uniform(kb, (1, d_hid), jnp.float32, -bound, bound)        # lin bias

    out = model_forward(x, y, p, w_lin_t, b_lin)   # bf16 MXU path (f32 accumulation) by default
    out = jax.block_until_ready(out)

    # Plain-JAX f32 reference with the same (aliased) parameters, un-folded.
    with jax.default_matmul_precision("highest"):
        h = x @ p + y
        h = jnp.maximum(h @ w_lin_t + b_lin, 0.0)
        ref = jnp.maximum((h @ p) @ w_lin_t + b_lin, 0.0)

    assert out.shape == (batch, d_hid)
    rel_err = jnp.max(jnp.abs(out - ref)) / (jnp.max(jnp.abs(ref)) + 1e-6)
    # bf16 MXU operands with f32 accumulation vs the f32 reference.
    assert rel_err < 3e-2, f"relative error too large: {rel_err}"

    print("KERNEL_OK")
</pallas_src>

<mosaic_0001>
module attributes {stable_mosaic.version = 11 : i64} {
  func.func @aliased_mlp_kernel(%arg0: i32, %arg1: memref<64x128xf32, #tpu.memory_space<vmem>>, %arg2: memref<64x128xf32, #tpu.memory_space<vmem>>, %arg3: memref<128x128xbf16, #tpu.memory_space<vmem>>, %arg4: memref<128x128xbf16, #tpu.memory_space<vmem>>, %arg5: memref<128x128xbf16, #tpu.memory_space<vmem>>, %arg6: memref<1x128xf32, #tpu.memory_space<vmem>>, %arg7: memref<64x128xf32, #tpu.memory_space<vmem>>) attributes {dimension_semantics = [#tpu.dimension_semantics<parallel>], iteration_bounds = array<i64: 1>, scalar_prefetch = 0 : i64, scratch_operands = 0 : i64, tpu.core_type = #tpu.core_type<tc>, window_params = [{transform_indices = @transform_0, window_bounds = array<i64: 64, 128>}, {transform_indices = @transform_1, window_bounds = array<i64: 64, 128>}, {pipeline_mode = #tpu.pipeline_mode<synchronous>, transform_indices = @transform_2, window_bounds = array<i64: 128, 128>}, {pipeline_mode = #tpu.pipeline_mode<synchronous>, transform_indices = @transform_3, window_bounds = array<i64: 128, 128>}, {pipeline_mode = #tpu.pipeline_mode<synchronous>, transform_indices = @transform_4, window_bounds = array<i64: 128, 128>}, {pipeline_mode = #tpu.pipeline_mode<synchronous>, transform_indices = @transform_5, window_bounds = array<i64: 1, 128>}, {transform_indices = @transform_6, window_bounds = array<i64: 64, 128>}]} {
    %c0 = arith.constant 0 : index
    %c0_0 = arith.constant 0 : index
    %0 = vector.load %arg6[%c0, %c0_0] : memref<1x128xf32, #tpu.memory_space<vmem>>, vector<1x128xf32>
    %c0_1 = arith.constant 0 : index
    %c0_2 = arith.constant 0 : index
    %1 = vector.load %arg1[%c0_1, %c0_2] : memref<64x128xf32, #tpu.memory_space<vmem>>, vector<64x128xf32>
    %2 = arith.truncf %1 : vector<64x128xf32> to vector<64x128xbf16>
    %c0_3 = arith.constant 0 : index
    %c0_4 = arith.constant 0 : index
    %3 = vector.load %arg3[%c0_3, %c0_4] : memref<128x128xbf16, #tpu.memory_space<vmem>>, vector<128x128xbf16>
    %cst = arith.constant dense<0.000000e+00> : vector<64x128xf32>
    %4 = tpu.matmul %2, %3, %cst {dimension_numbers = #tpu.dot_dimension_numbers<[1], [0], [0], [1], [0, 0, 1, 1], [], []>} : vector<64x128xbf16>, vector<128x128xbf16>, vector<64x128xf32> -> vector<64x128xf32>
    %c0_5 = arith.constant 0 : index
    %c0_6 = arith.constant 0 : index
    %5 = vector.load %arg2[%c0_5, %c0_6] : memref<64x128xf32, #tpu.memory_space<vmem>>, vector<64x128xf32>
    %6 = arith.addf %4, %5 : vector<64x128xf32>
    %7 = arith.truncf %6 : vector<64x128xf32> to vector<64x128xbf16>
    %c0_7 = arith.constant 0 : index
    %c0_8 = arith.constant 0 : index
    %8 = vector.load %arg4[%c0_7, %c0_8] : memref<128x128xbf16, #tpu.memory_space<vmem>>, vector<128x128xbf16>
    %cst_9 = arith.constant dense<0.000000e+00> : vector<64x128xf32>
    %9 = tpu.matmul %7, %8, %cst_9 {dimension_numbers = #tpu.dot_dimension_numbers<[1], [0], [0], [1], [0, 0, 1, 1], [], []>} : vector<64x128xbf16>, vector<128x128xbf16>, vector<64x128xf32> -> vector<64x128xf32>
    %10 = vector.broadcast %0 : vector<1x128xf32> to vector<64x128xf32>
    %11 = arith.addf %9, %10 : vector<64x128xf32>
    %cst_10 = arith.constant 0.000000e+00 : f32
    %12 = vector.broadcast %cst_10 : f32 to vector<64x128xf32>
    %13 = arith.maximumf %11, %12 : vector<64x128xf32>
    %14 = arith.truncf %13 : vector<64x128xf32> to vector<64x128xbf16>
    %c0_11 = arith.constant 0 : index
    %c0_12 = arith.constant 0 : index
    %15 = vector.load %arg5[%c0_11, %c0_12] : memref<128x128xbf16, #tpu.memory_space<vmem>>, vector<128x128xbf16>
    %cst_13 = arith.constant dense<0.000000e+00> : vector<64x128xf32>
    %16 = tpu.matmul %14, %15, %cst_13 {dimension_numbers = #tpu.dot_dimension_numbers<[1], [0], [0], [1], [0, 0, 1, 1], [], []>} : vector<64x128xbf16>, vector<128x128xbf16>, vector<64x128xf32> -> vector<64x128xf32>
    %17 = vector.broadcast %0 : vector<1x128xf32> to vector<64x128xf32>
    %18 = arith.addf %16, %17 : vector<64x128xf32>
    %cst_14 = arith.constant 0.000000e+00 : f32
    %19 = vector.broadcast %cst_14 : f32 to vector<64x128xf32>
    %20 = arith.maximumf %18, %19 : vector<64x128xf32>
    %c0_15 = arith.constant 0 : index
    %c0_16 = arith.constant 0 : index
    %21 = vector.load %arg7[%c0_15, %c0_16] : memref<64x128xf32, #tpu.memory_space<vmem>>, vector<64x128xf32>
    tpu.vector_store %arg7[%c0_15, %c0_16], %20 {strides = array<i32>} : memref<64x128xf32, #tpu.memory_space<vmem>>, vector<64x128xf32>,
    return
  }
  func.func @transform_0(%arg0: i32) -> (i32, i32) {
    %c0_i32 = arith.constant 0 : i32
    %c0_i32_0 = arith.constant 0 : i32
    return %arg0, %c0_i32 : i32, i32
  }
  func.func @transform_1(%arg0: i32) -> (i32, i32) {
    %c0_i32 = arith.constant 0 : i32
    %c0_i32_0 = arith.constant 0 : i32
    return %arg0, %c0_i32 : i32, i32
  }
  func.func @transform_2(%arg0: i32) -> (i32, i32) {
    %c0_i32 = arith.constant 0 : i32
    %c0_i32_0 = arith.constant 0 : i32
    %c0_i32_1 = arith.constant 0 : i32
    return %c0_i32, %c0_i32_0 : i32, i32
  }
  func.func @transform_3(%arg0: i32) -> (i32, i32) {
    %c0_i32 = arith.constant 0 : i32
    %c0_i32_0 = arith.constant 0 : i32
    %c0_i32_1 = arith.constant 0 : i32
    return %c0_i32, %c0_i32_0 : i32, i32
  }
  func.func @transform_4(%arg0: i32) -> (i32, i32) {
    %c0_i32 = arith.constant 0 : i32
    %c0_i32_0 = arith.constant 0 : i32
    %c0_i32_1 = arith.constant 0 : i32
    return %c0_i32, %c0_i32_0 : i32, i32
  }
  func.func @transform_5(%arg0: i32) -> (i32, i32) {
    %c0_i32 = arith.constant 0 : i32
    %c0_i32_0 = arith.constant 0 : i32
    %c0_i32_1 = arith.constant 0 : i32
    return %c0_i32, %c0_i32_0 : i32, i32
  }
  func.func @transform_6(%arg0: i32) -> (i32, i32) {
    %c0_i32 = arith.constant 0 : i32
    %c0_i32_0 = arith.constant 0 : i32
    return %arg0, %c0_i32 : i32, i32
  }
}

</mosaic_0001>

<bundles_post_ra>
// kernel: tpu_custom_call.1
= control target key start
LH: loop header
LB: loop body
LE: loop exit
PB: predicated region body
PF: predicated region fallthrough
CT: control target
= control target key end

     0   :  { %11 = vsyncpa [#allocation3], 0  ;;  %s842_s0 = inlined_call_operand.hbm [shape: f32[64,128], index: 0, kind: input, shape index: {}]   ;;  %s843_s1 = inlined_call_operand.hbm [shape: f32[64,128], index: 1, kind: input, shape index: {}]   ;;  %s844_s2 = inlined_call_operand.hbm [shape: bf16[128,128], index: 2, kind: input, shape index: {}]   ;;  %s845_s3 = inlined_call_operand.hbm [shape: bf16[128,128], index: 3, kind: input, shape index: {}]   ;;  %s846_s4 = inlined_call_operand.hbm [shape: bf16[128,128], index: 4, kind: input, shape index: {}]   ;;  %s847_s5 = inlined_call_operand.vmem [shape: f32[1,128], index: 5, kind: input, shape index: {}]   ;;  %s848_s6 = inlined_call_operand.hbm [shape: f32[64,128], index: 6, kind: output, shape index: {}]  }
   0x1   :  { %12 = vsyncpa [#allocation6], 0 }
   0x2   :  { %13 = vsyncpa [#allocation9], 0 }
   0x3   :  { %14 = vsyncpa [#allocation4], 0  ;;  %s32_s23 = sshll.u32 %s843_s1, 4  ;;  %s749_s24 = smov [#allocation5]   ;;  %s33_s23 = int_to_ptr.hbm [resolvable:$true] %s32_s23 }
   0x4   :  { %s34_s25 = sshll.u32 %s749_s24, 4  ;;  %s750_s26 = smov 128   ;;  %s35_s25 = int_to_ptr.vmem [resolvable:$true] %s34_s25 }
   0x5   :  { %s751_s27 = smov 8   ;;  %s58_s30 = sshll.u32 %s845_s3, 4  ;;  %s59_s30 = int_to_ptr.hbm [resolvable:$true] %s58_s30 }
   0x6   :  { %40 = dma.hbm_to_vmem [thread:$0]  %s33_s23, 1024, %s35_s25, [#allocation6], %s750_s26, %s750_s26, %s751_s27  }
   0x7   :  { %s752_s7 = smov [#allocation8]   ;;  %s19_s1 = sshll.u32 %s842_s0, 4  ;;  %s20_s1 = int_to_ptr.hbm [resolvable:$true] %s19_s1 }
   0x8   :  { %s60_s8 = sshll.u32 %s752_s7, 4  ;;  %s753_s11 = smov 64   ;;  %s61_s8 = int_to_ptr.vmem [resolvable:$true] %s60_s8 }
   0x9   :  { %s754_s12 = smov 4   ;;  %s45_s15 = sshll.u32 %s844_s2, 4  ;;  %s46_s15 = int_to_ptr.hbm [resolvable:$true] %s45_s15 }
   0xa   :  { %66 = dma.hbm_to_vmem [thread:$0]  %s59_s30, 1024, %s61_s8, [#allocation9], %s753_s11, %s753_s11, %s754_s12  }
   0xb   :  { %s755_s16 = smov [#allocation2]   ;;  %s756_s3 = smov [#allocation7]  }
   0xc   :  { %s21_s17 = sshll.u32 %s755_s16, 4  ;;  %s47_s18 = sshll.u32 %s756_s3, 4  ;;  %s22_s17 = int_to_ptr.vmem [resolvable:$true] %s21_s17  ;;  %s48_s18 = int_to_ptr.vmem [resolvable:$true] %s47_s18 }
   0xd   :  { %27 = dma.hbm_to_vmem [thread:$0]  %s20_s1, 1024, %s22_s17, [#allocation3], %s750_s26, %s750_s26, %s751_s27  }
   0xe   :  { %s71_s20 = sshll.u32 %s846_s4, 4  ;;  %s757_s21 = smov [#allocation10]   ;;  %s72_s20 = int_to_ptr.hbm [resolvable:$true] %s71_s20 }
   0xf   :  { %53 = dma.hbm_to_vmem [thread:$0]  %s46_s15, 1024, %s48_s18, [#allocation6], %s753_s11, %s753_s11, %s754_s12  }
  0x10   :  { %s73_s22 = sshll.u32 %s757_s21, 4  ;;  %s74_s22 = int_to_ptr.vmem [resolvable:$true] %s73_s22 }
  0x11   :  { %79 = dma.hbm_to_vmem [thread:$0]  %s72_s20, 1024, %s74_s22, [#allocation9], %s753_s11, %s753_s11, %s754_s12  }
  0x12   :  { %741 = dma.done.wait [#allocation3], 1024  }
  0x13   :  { %742 = vsyncadd [#allocation3], 4294966272 }
  0x14   :  { %743 = dma.done.wait [#allocation6], 2048  }
  0x15   :  { %744 = vsyncadd [#allocation6], 4294965248 }
  0x16   :  { %745 = dma.done.wait [#allocation9], 2048  }
  0x17   :  { %746 = vsyncadd [#allocation9], 4294965248  ;;  %v561_v0 = vld [vmem:[#allocation7 + $0x38] sm:$0xff]  ;;  %v560_v1 = vld [vmem:[#allocation7 + $0x30] sm:$0xff]  ;;  %s443_s28 = sshll.u32 %s848_s6, 4  ;;  %s444_s28 = int_to_ptr.hbm [resolvable:$true] %s443_s28 }
  0x18   :  { %187 = vmatpush.bf16.msra.mxu0 %v561_v0  ;;  %578 = vmatpush.bf16.msra.mxu3 %v561_v0  ;;  %v559_v2 = vld [vmem:[#allocation7 + $0x28] sm:$0xff]  ;;  %v558_v3 = vld [vmem:[#allocation7 + $0x20] sm:$0xff]  ;;  %v557_v4 = vld [vmem:[#allocation7 + $0x18] sm:$0xff] }
  0x19   :  { %v556_v5 = vld [vmem:[#allocation7 + $0x10] sm:$0xff]  ;;  %v555_v6 = vld [vmem:[#allocation7 + $0x8] sm:$0xff]  ;;  %v554_v7 = vld [vmem:[#allocation7] sm:$0xff] }
  0x1a   :  { %v103_v8 = vld [vmem:[#allocation2] sm:$0xff]  ;;  %v104_v9 = vld [vmem:[#allocation2 + $0x8] sm:$0xff]  ;;  %v105_v10 = vld [vmem:[#allocation2 + $0x10] sm:$0xff] }
  0x1b   :  { %v106_v11 = vld [vmem:[#allocation2 + $0x18] sm:$0xff]  ;;  %v111_v12 = vpack.c.bf16 %v104_v9, %v103_v8  ;;  %v568_v15 = vld [vmem:[#allocation8 + $0x30] sm:$0xff]  ;;  %v567_v16 = vld [vmem:[#allocation8 + $0x28] sm:$0xff] }
  0x1c   :  { %188 = vmatpush.bf16.msra.mxu0 %v560_v1  ;;  %579 = vmatpush.bf16.msra.mxu3 %v560_v1  ;;  %v112_v13 = vpack.c.bf16 %v106_v11, %v105_v10  ;;  %v569_v14 = vld [vmem:[#allocation8 + $0x38] sm:$0xff]  ;;  %v107_v17 = vld [vmem:[#allocation2 + $0x20] sm:$0xff]  ;;  %v108_v18 = vld [vmem:[#allocation2 + $0x28] sm:$0xff] }
  0x1d   :  { %287 = vmatpush.bf16.msra.mxu1 %v569_v14  ;;  %v566_v19 = vld [vmem:[#allocation8 + $0x20] sm:$0xff]  ;;  %v113_v20 = vpack.c.bf16 %v108_v18, %v107_v17  ;;  %v565_v21 = vld [vmem:[#allocation8 + $0x18] sm:$0xff]  ;;  %v109_v22 = vld [vmem:[#allocation2 + $0x30] sm:$0xff] }
  0x1e   :  { %v110_v23 = vld [vmem:[#allocation2 + $0x38] sm:$0xff]  ;;  %v564_v25 = vld [vmem:[#allocation8 + $0x10] sm:$0xff]  ;;  %v563_v26 = vld [vmem:[#allocation8 + $0x8] sm:$0xff] }
  0x1f   :  { %v114_v24 = vpack.c.bf16 %v110_v23, %v109_v22  ;;  %v562_v27 = vld [vmem:[#allocation8] sm:$0xff]  ;;  %v132_v30 = vld [vmem:[#allocation5 + $0x8] sm:$0xff]  ;;  %v133_v37 = vld [vmem:[#allocation5 + $0x10] sm:$0xff] }
  0x20   :  { %189 = vmatpush.bf16.msra.mxu0 %v559_v2  ;;  %580 = vmatpush.bf16.msra.mxu3 %v559_v2  ;;  %v131_v29 = vld [vmem:[#allocation5] sm:$0xff]  ;;  %v134_v38 = vld [vmem:[#allocation5 + $0x18] sm:$0xff]  ;;  %v576_v44 = vld [vmem:[#allocation10 + $0x30] sm:$0xff] }
  0x21   :  { %288 = vmatpush.bf16.msra.mxu1 %v568_v15  ;;  %v577_v43 = vld [vmem:[#allocation10 + $0x38] sm:$0xff]  ;;  %v575_v46 = vld [vmem:[#allocation10 + $0x28] sm:$0xff]  ;;  %v135_v47 = vld [vmem:[#allocation5 + $0x20] sm:$0xff] }
  0x22   :  { %392 = vmatpush.bf16.msra.mxu2 %v577_v43  ;;  %v136_v48 = vld [vmem:[#allocation5 + $0x28] sm:$0xff]  ;;  %v574_v51 = vld [vmem:[#allocation10 + $0x20] sm:$0xff]  ;;  %v137_v54 = vld [vmem:[#allocation5 + $0x30] sm:$0xff] }
  0x23   :  { %v138_v55 = vld [vmem:[#allocation5 + $0x38] sm:$0xff]  ;;  %v572_v61 = vld [vmem:[#allocation10 + $0x10] sm:$0xff]  ;;  %v571_v62 = vld [vmem:[#allocation10 + $0x8] sm:$0xff] }
  0x24   :  { %190 = vmatpush.bf16.msra.mxu0 %v558_v3  ;;  %581 = vmatpush.bf16.msra.mxu3 %v558_v3  ;;  %v573_v60 = vld [vmem:[#allocation10 + $0x18] sm:$0xff]  ;;  %v570_v63 = vld [vmem:[#allocation10] sm:$0xff] }
  0x25   :  { %289 = vmatpush.bf16.msra.mxu1 %v567_v16  ;;  %v818_v1 = vld [vmem:[%s847_s5] ss:$0 sm:$0xff]  ;;  %s758_s5 = smov [#allocation11]  }
  0x26   :  { %393 = vmatpush.bf16.msra.mxu2 %v576_v44  ;;  %s441_s23 = sshll.u32 %s758_s5, 4  ;;  %s442_s23 = int_to_ptr.vmem [resolvable:$true] %s441_s23 }
  0x28   :  { %191 = vmatpush.bf16.msra.mxu0 %v557_v4  ;;  %582 = vmatpush.bf16.msra.mxu3 %v557_v4 }
  0x29   :  { %290 = vmatpush.bf16.msra.mxu1 %v566_v19 }
  0x2a   :  { %394 = vmatpush.bf16.msra.mxu2 %v575_v46 }
  0x2c   :  { %192 = vmatpush.bf16.msra.mxu0 %v556_v5  ;;  %583 = vmatpush.bf16.msra.mxu3 %v556_v5 }
  0x2d   :  { %291 = vmatpush.bf16.msra.mxu1 %v565_v21 }
  0x2e   :  { %395 = vmatpush.bf16.msra.mxu2 %v574_v51 }
  0x30   :  { %193 = vmatpush.bf16.msra.mxu0 %v555_v6  ;;  %584 = vmatpush.bf16.msra.mxu3 %v555_v6 }
  0x31   :  { %292 = vmatpush.bf16.msra.mxu1 %v564_v25 }
  0x32   :  { %396 = vmatpush.bf16.msra.mxu2 %v573_v60 }
  0x34   :  { %194 = vmatpush.bf16.msra.mxu0 %v554_v7  ;;  %585 = vmatpush.bf16.msra.mxu3 %v554_v7 }
  0x35   :  { %293 = vmatpush.bf16.msra.mxu1 %v563_v26 }
  0x36   :  { %397 = vmatpush.bf16.msra.mxu2 %v572_v61 }
  0x37   :  { %195 = vmatmul.bf16.vlgmr.msra.gmra.mxu0 %v111_v12  ;;  %200 = vmatmul.bf16.vlgmr.msra.gmra.mxu3 %v112_v13 }
  0x39   :  { %294 = vmatpush.bf16.msra.mxu1 %v562_v27 }
  0x3a   :  { %398 = vmatpush.bf16.msra.mxu2 %v571_v62 }
  0x3e   :  { %399 = vmatpush.bf16.msra.mxu2 %v570_v63 }
  0x47   :  { %205 = vmatmul.bf16.gmra.mxu3 %v113_v20 }
  0x57   :  { %210 = vmatmul.bf16.gmra.mxu3 %v114_v24 }
  0xb4   :  { %v196_v28 = vpop.f32.mrf.mxu0 }
  0xb5   :  { %v197_v33 = vadd.f32 %v196_v28, %v131_v29 }
  0xba   :  { %v201_v31 = vpop.f32.mrf.mxu3 }
  0xbb   :  { %v202_v40 = vadd.f32 %v201_v31, %v133_v37 }
  0xbc   :  { %v198_v32 = vpop.f32.mrf.mxu0 }
  0xbd   :  { %v199_v34 = vadd.f32 %v198_v32, %v132_v30 }
  0xbf   :  { %v216_v35 = vpack.c.bf16 %v199_v34, %v197_v33 }
  0xc1   :  { %295 = vmatmul.bf16.vlgmr.msra.gmra.mxu1 %v216_v35 }
  0xc2   :  { %v203_v36 = vpop.f32.mrf.mxu3 }
  0xc3   :  { %v204_v41 = vadd.f32 %v203_v36, %v134_v38 }
  0xc5   :  { %v217_v42 = vpack.c.bf16 %v204_v41, %v202_v40 }
  0xca   :  { %v206_v39 = vpop.f32.mrf.mxu3 }
  0xcb   :  { %v207_v49 = vadd.f32 %v206_v39, %v135_v47 }
  0xd1   :  { %300 = vmatmul.bf16.gmra.mxu1 %v217_v42 }
  0xd2   :  { %v208_v45 = vpop.f32.mrf.mxu3 }
  0xd3   :  { %v209_v50 = vadd.f32 %v208_v45, %v136_v48 }
  0xd5   :  { %v218_v53 = vpack.c.bf16 %v209_v50, %v207_v49 }
  0xda   :  { %v211_v52 = vpop.f32.mrf.mxu3 }
  0xdb   :  { %v212_v57 = vadd.f32 %v211_v52, %v137_v54 }
  0xe1   :  { %305 = vmatmul.bf16.gmra.mxu1 %v218_v53 }
  0xe2   :  { %v213_v56 = vpop.f32.mrf.mxu3 }
  0xe3   :  { %v214_v58 = vadd.f32 %v213_v56, %v138_v55 }
  0xe5   :  { %v219_v59 = vpack.c.bf16 %v214_v58, %v212_v57 }
  0xf1   :  { %310 = vmatmul.bf16.gmra.mxu1 %v219_v59 }
 0x13e   :  { %v296_v0 = vpop.f32.mrf.mxu1 }
 0x13f   :  { %v297_v2 = vadd.f32 %v818_v1, %v296_v0 }
 0x141   :  { %v316_v5 = vmax.f32 %v297_v2, 0.0 }
 0x146   :  { %v298_v3 = vpop.f32.mrf.mxu1 }
 0x147   :  { %v299_v4 = vadd.f32 %v818_v1, %v298_v3 }
 0x149   :  { %v317_v6 = vmax.f32 %v299_v4, 0.0 }
 0x14b   :  { %v324_v7 = vpack.c.bf16 %v317_v6, %v316_v5 }
 0x14d   :  { %400 = vmatmul.bf16.vlgmr.msra.gmra.mxu2 %v324_v7 }
 0x14e   :  { %v301_v8 = vpop.f32.mrf.mxu1 }
 0x14f   :  { %v302_v9 = vadd.f32 %v818_v1, %v301_v8 }
 0x151   :  { %v318_v12 = vmax.f32 %v302_v9, 0.0 }
 0x156   :  { %v303_v10 = vpop.f32.mrf.mxu1 }
 0x157   :  { %v304_v11 = vadd.f32 %v818_v1, %v303_v10 }
 0x159   :  { %v319_v13 = vmax.f32 %v304_v11, 0.0 }
 0x15b   :  { %v325_v14 = vpack.c.bf16 %v319_v13, %v318_v12 }
 0x15d   :  { %405 = vmatmul.bf16.gmra.mxu2 %v325_v14 }
 0x15e   :  { %v306_v15 = vpop.f32.mrf.mxu1 }
 0x15f   :  { %v307_v16 = vadd.f32 %v818_v1, %v306_v15 }
 0x161   :  { %v320_v19 = vmax.f32 %v307_v16, 0.0 }
 0x166   :  { %v308_v17 = vpop.f32.mrf.mxu1 }
 0x167   :  { %v309_v18 = vadd.f32 %v818_v1, %v308_v17 }
 0x169   :  { %v321_v20 = vmax.f32 %v309_v18, 0.0 }
 0x16b   :  { %v326_v21 = vpack.c.bf16 %v321_v20, %v320_v19 }
 0x16d   :  { %410 = vmatmul.bf16.gmra.mxu2 %v326_v21 }
 0x16e   :  { %v311_v22 = vpop.f32.mrf.mxu1 }
 0x16f   :  { %v312_v23 = vadd.f32 %v818_v1, %v311_v22 }
 0x171   :  { %v322_v26 = vmax.f32 %v312_v23, 0.0 }
 0x176   :  { %v313_v24 = vpop.f32.mrf.mxu1 }
 0x177   :  { %v314_v25 = vadd.f32 %v818_v1, %v313_v24 }
 0x179   :  { %v323_v27 = vmax.f32 %v314_v25, 0.0 }
 0x17b   :  { %v327_v28 = vpack.c.bf16 %v323_v27, %v322_v26 }
 0x17d   :  { %415 = vmatmul.bf16.gmra.mxu2 %v327_v28 }
 0x1d0   :  { %v401_v29 = vpop.f32.mrf.mxu2 }
 0x1d1   :  { %v402_v30 = vadd.f32 %v818_v1, %v401_v29 }
 0x1d3   :  { %v421_v31 = vmax.f32 %v402_v30, 0.0 }
 0x1d5   :  { %429 = vst [vmem:[#allocation11] sm:$0xff] %v421_v31 }
 0x1d8   :  { %v403_v32 = vpop.f32.mrf.mxu2 }
 0x1d9   :  { %v404_v33 = vadd.f32 %v818_v1, %v403_v32 }
 0x1db   :  { %v422_v34 = vmax.f32 %v404_v33, 0.0 }
 0x1dd   :  { %430 = vst [vmem:[#allocation11 + $0x8] sm:$0xff] %v422_v34 }
 0x1e0   :  { %v406_v35 = vpop.f32.mrf.mxu2 }
 0x1e1   :  { %v407_v36 = vadd.f32 %v818_v1, %v406_v35 }
 0x1e3   :  { %v423_v37 = vmax.f32 %v407_v36, 0.0 }
 0x1e5   :  { %431 = vst [vmem:[#allocation11 + $0x10] sm:$0xff] %v423_v37 }
 0x1e8   :  { %v408_v38 = vpop.f32.mrf.mxu2 }
 0x1e9   :  { %v409_v39 = vadd.f32 %v818_v1, %v408_v38 }
 0x1eb   :  { %v424_v40 = vmax.f32 %v409_v39, 0.0 }
 0x1ed   :  { %432 = vst [vmem:[#allocation11 + $0x18] sm:$0xff] %v424_v40 }
 0x1f0   :  { %v411_v41 = vpop.f32.mrf.mxu2 }
 0x1f1   :  { %v412_v42 = vadd.f32 %v818_v1, %v411_v41 }
 0x1f3   :  { %v425_v43 = vmax.f32 %v412_v42, 0.0 }
 0x1f5   :  { %433 = vst [vmem:[#allocation11 + $0x20] sm:$0xff] %v425_v43 }
 0x1f8   :  { %v413_v44 = vpop.f32.mrf.mxu2 }
 0x1f9   :  { %v414_v45 = vadd.f32 %v818_v1, %v413_v44 }
 0x1fb   :  { %v426_v46 = vmax.f32 %v414_v45, 0.0 }
 0x1fd   :  { %434 = vst [vmem:[#allocation11 + $0x28] sm:$0xff] %v426_v46 }
 0x200   :  { %v416_v47 = vpop.f32.mrf.mxu2 }
 0x201   :  { %v417_v48 = vadd.f32 %v818_v1, %v416_v47 }
 0x203   :  { %v427_v49 = vmax.f32 %v417_v48, 0.0 }
 0x205   :  { %435 = vst [vmem:[#allocation11 + $0x30] sm:$0xff] %v427_v49 }
 0x208   :  { %v418_v50 = vpop.f32.mrf.mxu2 }
 0x209   :  { %v419_v51 = vadd.f32 %v818_v1, %v418_v50 }
 0x20b   :  { %v428_v52 = vmax.f32 %v419_v51, 0.0 }
 0x20d   :  { %436 = vst [vmem:[#allocation11 + $0x38] sm:$0xff] %v428_v52 }
 0x20e   :  { %449 = dma.vmem_to_hbm [thread:$0]  %s442_s23, 1024, %s444_s28, [#allocation4], %s750_s26, %s750_s26, %s751_s27  }
 0x20f   :  { %747 = dma.done.wait [#allocation4], 1024  }
 0x210   :  { %748 = vsyncadd [#allocation4], 4294966272 }
 0x211   :  { %454 = vsyncpa [#allocation3], 1 }
 0x212   :  { %455 = vsyncpa [#allocation6], 1 }
 0x213   :  { %456 = vsyncpa [#allocation9], 1 }
 0x214   :  { %457 = vsyncpa [#allocation4], 1 }

</bundles_post_ra>
